<compile_context>
chip_gen: v7x
topology: tpu7x:2x2x1
jax: 0.10.0
libtpu: 0.0.40
codegen_flags: <defaults>
</compile_context>

<pallas_src>
import functools
import math

import jax
import jax.numpy as jnp
from jax.experimental import pallas as pl
from jax.experimental.pallas import tpu as pltpu


_LANE = 128
BN_EPS = 1e-3
STEM_CH = 32
HEAD_CH = 1280

# (expand_ratio, kernel, stride, in_ch, out_ch, repeats)  -- torchvision B1
_B1_STAGES = [
    (1, 3, 1, 32, 16, 2),
    (6, 3, 2, 16, 24, 3),
    (6, 5, 2, 24, 40, 3),
    (6, 3, 2, 40, 80, 4),
    (6, 5, 1, 80, 112, 4),
    (6, 5, 2, 112, 192, 5),
    (6, 3, 1, 192, 320, 2),
]


def _cp(c):
    """Pad a channel count up to a multiple of 128 (lane-dense)."""
    return ((c + _LANE - 1) // _LANE) * _LANE


def _pad_to(x, m):
    return ((x + m - 1) // m) * m


# ----------------------- fused matmul (1x1 conv / stem / head) --------------

def _mm_kernel(a_ref, b_ref, bias_ref, o_ref, *, act):
    acc = jnp.dot(a_ref[...], b_ref[...], preferred_element_type=jnp.float32)
    r = acc + bias_ref[...]
    if act == "silu":
        r = r * jax.nn.sigmoid(r)
    o_ref[...] = r.astype(o_ref.dtype)


def matmul_bias_act(a, w, bias, act=None, out_dtype=jnp.bfloat16):
    """act(a @ w + bias). w:(Kp,Np) bf16 (pre-padded), bias:(1,Np) f32.
    Full K / full N stay resident in VMEM; only M is tiled."""
    M, K = a.shape
    Kp, Np = w.shape
    assert K <= Kp
    if K < Kp:
        a = jnp.pad(a, ((0, 0), (0, Kp - K)))
    a = a.astype(jnp.bfloat16)

    Mp = M
    bm = None
    for cand in (256, 128, 64, 32, 16, 8):
        if Mp % cand == 0:
            bm = cand
            break
    if bm is None:
        Mp = _pad_to(M, 8)
        bm = 8
        a = jnp.pad(a, ((0, Mp - M), (0, 0)))

    out = pl.pallas_call(
        functools.partial(_mm_kernel, act=act),
        out_shape=jax.ShapeDtypeStruct((Mp, Np), out_dtype),
        grid_spec=pltpu.PrefetchScalarGridSpec(
            num_scalar_prefetch=0,
            grid=(Mp // bm,),
            in_specs=[
                pl.BlockSpec((bm, Kp), lambda i: (i, 0)),
                pl.BlockSpec((Kp, Np), lambda i: (0, 0)),   # weight: resident
                pl.BlockSpec((1, Np), lambda i: (0, 0)),
            ],
            out_specs=pl.BlockSpec((bm, Np), lambda i: (i, 0)),
        ),
        compiler_params=pltpu.CompilerParams(
            dimension_semantics=("parallel",)),
    )(a, w, bias)
    return out if Mp == M else out[:M]


# ---------------- fused projection: SE scale + matmul + bias (+ residual) ---

def _proj_kernel(a_ref, s_ref, w_ref, bias_ref, *rest, has_res):
    if has_res:
        res_ref, o_ref = rest
    else:
        (o_ref,) = rest
    # SE channel scale applied to the matmul LHS (f32 multiply, bf16 to MXU).
    a = (a_ref[0].astype(jnp.float32) * s_ref[0]).astype(jnp.bfloat16)
    r = jnp.dot(a, w_ref[...], preferred_element_type=jnp.float32)
    r = r + bias_ref[...]
    if has_res:
        r = r + res_ref[0].astype(jnp.float32)
    o_ref[0] = r.astype(o_ref.dtype)


def proj_matmul(h, s2, w, bias, res=None, out_dtype=jnp.bfloat16):
    """(h * s2[:, None, :]) @ w + bias (+ res).
    h:(N,M,K) bf16, s2:(N,K) f32, w:(K,Np) bf16, bias:(1,Np) f32, res:(N,M,Np)."""
    N, M, K = h.shape
    Kw, Np = w.shape
    assert K == Kw
    bm = M
    for cand in (256, 128, 64, 32, 16, 8):
        if M % cand == 0:
            bm = cand
            break
    s2r = s2.reshape(N, 1, K).astype(jnp.float32)
    has_res = res is not None

    in_specs = [
        pl.BlockSpec((1, bm, K), lambda n, m: (n, m, 0)),
        pl.BlockSpec((1, 1, K), lambda n, m: (n, 0, 0)),
        pl.BlockSpec((K, Np), lambda n, m: (0, 0)),
        pl.BlockSpec((1, Np), lambda n, m: (0, 0)),
    ]
    args = [h.astype(jnp.bfloat16), s2r, w, bias]
    if has_res:
        in_specs.append(pl.BlockSpec((1, bm, Np), lambda n, m: (n, m, 0)))
        args.append(res.astype(jnp.bfloat16))

    return pl.pallas_call(
        functools.partial(_proj_kernel, has_res=has_res),
        out_shape=jax.ShapeDtypeStruct((N, M, Np), out_dtype),
        grid_spec=pltpu.PrefetchScalarGridSpec(
            num_scalar_prefetch=0,
            grid=(N, M // bm),
            in_specs=in_specs,
            out_specs=pl.BlockSpec((1, bm, Np), lambda n, m: (n, m, 0)),
        ),
        compiler_params=pltpu.CompilerParams(
            dimension_semantics=("parallel", "parallel")),
    )(*args)


# ------------------- depthwise conv + SiLU with fused SE pool ---------------

def _pick_th(Ho, Wo, Cp, budget=16384):
    """Largest power-of-two row tile dividing Ho with f32 acc <= ~64 KiB."""
    th = Ho
    while th > 1 and th % 2 == 0 and th * Wo * Cp > budget:
        th //= 2
    return th


def _dw_s1_kernel(x_ref, w_ref, b_ref, o_ref, pool_ref, *, k, th):
    """Stride-1 depthwise kxk conv + bias + SiLU on one output row tile,
    plus the SE global-pool partial sum for this tile."""
    row0 = pl.multiple_of(pl.program_id(1) * th, th)
    W = o_ref.shape[2]
    Cp = o_ref.shape[3]
    acc = jnp.zeros((th, W, Cp), jnp.float32)
    for i in range(k):
        xi = x_ref[0, pl.ds(row0 + i, th), :, :].astype(jnp.float32)
        for j in range(k):
            acc = acc + xi[:, j:j + W, :] * w_ref[i * k + j, :]
    r = acc + b_ref[0]
    y = r * jax.nn.sigmoid(r)
    o_ref[0] = y.astype(o_ref.dtype)
    s = jnp.sum(y, axis=(0, 1))
    pool_ref[0, 0] = jnp.broadcast_to(s[None, :], (8, Cp))


def _dw_s2_kernel(p00_ref, p01_ref, p10_ref, p11_ref, w_ref, b_ref,
                  o_ref, pool_ref, *, k, th):
    """Stride-2 depthwise conv over 4 row/col parity planes (only the kept
    output rows/cols are ever computed), + bias + SiLU + SE pool partial."""
    planes = (p00_ref, p01_ref, p10_ref, p11_ref)
    row0 = pl.multiple_of(pl.program_id(1) * th, th)
    Wo = o_ref.shape[2]
    Cp = o_ref.shape[3]
    acc = jnp.zeros((th, Wo, Cp), jnp.float32)
    for i in range(k):
        pr, di = i % 2, i // 2
        for pc in range(2):
            xi = planes[pr * 2 + pc][0, pl.ds(row0 + di, th), :, :]
            xi = xi.astype(jnp.float32)
            for j in range(pc, k, 2):
                dj = j // 2
                acc = acc + xi[:, dj:dj + Wo, :] * w_ref[i * k + j, :]
    r = acc + b_ref[0]
    y = r * jax.nn.sigmoid(r)
    o_ref[0] = y.astype(o_ref.dtype)
    s = jnp.sum(y, axis=(0, 1))
    pool_ref[0, 0] = jnp.broadcast_to(s[None, :], (8, Cp))


def dwconv_bn_silu(x, w, bias, k, stride):
    """Depthwise kxk conv (BN folded) + SiLU with fused SE average pool.
    x:(N,H,W,Cp) bf16, w:(k*k,Cp) f32, bias:(1,Cp) f32.
    Returns (h:(N,Ho,Wo,Cp) bf16, pooled:(N,Cp) f32)."""
    N, H, W, Cp = x.shape
    pad = (k - 1) // 2

    if stride == 1:
        Ho, Wo = H, W
        xp = jnp.pad(x, ((0, 0), (pad, pad), (pad, pad), (0, 0)))
        Hp, Wp = H + 2 * pad, W + 2 * pad
        th = _pick_th(Ho, Wo, Cp)
        T = Ho // th
        kern = functools.partial(_dw_s1_kernel, k=k, th=th)
        in_specs = [
            pl.BlockSpec((1, Hp, Wp, Cp), lambda n, t: (n, 0, 0, 0)),
            pl.BlockSpec((k * k, Cp), lambda n, t: (0, 0)),
            pl.BlockSpec((1, Cp), lambda n, t: (0, 0)),
        ]
        args = (xp, w, bias)
    else:
        assert stride == 2 and H % 2 == 0 and W % 2 == 0
        Ho, Wo = H // 2, W // 2
        xp = jnp.pad(x, ((0, 0), (pad, pad), (pad, pad), (0, 0)))
        planes = [xp[:, pr::2, pc::2, :] for pr in range(2) for pc in range(2)]
        Hq, Wq = planes[0].shape[1], planes[0].shape[2]
        th = _pick_th(Ho, Wo, Cp)
        T = Ho // th
        kern = functools.partial(_dw_s2_kernel, k=k, th=th)
        plane_spec = pl.BlockSpec((1, Hq, Wq, Cp), lambda n, t: (n, 0, 0, 0))
        in_specs = [plane_spec, plane_spec, plane_spec, plane_spec,
                    pl.BlockSpec((k * k, Cp), lambda n, t: (0, 0)),
                    pl.BlockSpec((1, Cp), lambda n, t: (0, 0))]
        args = tuple(planes) + (w, bias)

    h, pool = pl.pallas_call(
        kern,
        out_shape=(jax.ShapeDtypeStruct((N, Ho, Wo, Cp), jnp.bfloat16),
                   jax.ShapeDtypeStruct((N, T, 8, Cp), jnp.float32)),
        grid_spec=pltpu.PrefetchScalarGridSpec(
            num_scalar_prefetch=0,
            grid=(N, T),
            in_specs=in_specs,
            out_specs=(
                pl.BlockSpec((1, th, Wo, Cp), lambda n, t: (n, t, 0, 0)),
                pl.BlockSpec((1, 1, 8, Cp), lambda n, t: (n, t, 0, 0)),
            ),
        ),
        compiler_params=pltpu.CompilerParams(
            dimension_semantics=("parallel", "parallel")),
    )(*args)

    pooled = pool[:, :, 0, :].sum(axis=1) / float(Ho * Wo)
    return h, pooled


# --------------------------- EfficientNet-B1 model --------------------------

def init_params(seed=0, num_classes=1000):
    key = jax.random.PRNGKey(seed)
    counter = [0]

    def nk():
        counter[0] += 1
        return jax.random.fold_in(key, counter[0])

    def bn_fold(c_out):
        gamma = 1.0 + 0.1 * jax.random.normal(nk(), (c_out,), jnp.float32)
        beta = 0.1 * jax.random.normal(nk(), (c_out,), jnp.float32)
        mean = 0.1 * jax.random.normal(nk(), (c_out,), jnp.float32)
        var = jnp.abs(1.0 + 0.1 * jax.random.normal(nk(), (c_out,), jnp.float32))
        scale = gamma / jnp.sqrt(var + BN_EPS)
        return scale, beta - mean * scale

    def conv1x1_bn(c_in, c_out):
        """1x1 conv + folded BN, pre-padded once to lane-dense (Kp, Np) bf16."""
        kp, np_ = _cp(c_in), _cp(c_out)
        w = jax.random.normal(nk(), (c_in, c_out), jnp.float32) / math.sqrt(c_in)
        scale, shift = bn_fold(c_out)
        wp = jnp.zeros((kp, np_), jnp.float32).at[:c_in, :c_out].set(w * scale)
        bp = jnp.zeros((1, np_), jnp.float32).at[0, :c_out].set(shift)
        return {"w": wp.astype(jnp.bfloat16), "b": bp}

    def dw_bn(k, c):
        cp = _cp(c)
        w = jax.random.normal(nk(), (k, k, c), jnp.float32) / math.sqrt(k * k)
        scale, shift = bn_fold(c)
        w = (w * scale).reshape(k * k, c)
        wp = jnp.zeros((k * k, cp), jnp.float32).at[:, :c].set(w)
        bp = jnp.zeros((1, cp), jnp.float32).at[0, :c].set(shift)
        return {"w": wp, "b": bp}

    def linear(c_in, c_out, pad_in=None, pad_out=None):
        ip = c_in if pad_in is None else pad_in
        op = c_out if pad_out is None else pad_out
        w = jax.random.normal(nk(), (c_in, c_out), jnp.float32) / math.sqrt(c_in)
        b = 0.01 * jax.random.normal(nk(), (c_out,), jnp.float32)
        wp = jnp.zeros((ip, op), jnp.float32).at[:c_in, :c_out].set(w)
        bp = jnp.zeros((op,), jnp.float32).at[:c_out].set(b)
        return wp, bp

    params = {}

    # stem: Conv2d(3,32,k=3,s=2,p=1)+BN+SiLU as an im2col matmul.
    # K = 27 is padded only to 32 (full-K block), not 128, per perf review.
    sw = jax.random.normal(nk(), (27, STEM_CH), jnp.float32) / math.sqrt(27)
    scale, shift = bn_fold(STEM_CH)
    swp = jnp.zeros((32, _cp(STEM_CH)), jnp.float32).at[:27, :STEM_CH].set(sw * scale)
    sbp = jnp.zeros((1, _cp(STEM_CH)), jnp.float32).at[0, :STEM_CH].set(shift)
    params["stem"] = {"w": swp.astype(jnp.bfloat16), "b": sbp}

    blocks = []
    for (expand, k, stride, c_in, c_out, repeats) in _B1_STAGES:
        for r in range(repeats):
            bin_ = c_in if r == 0 else c_out
            bstride = stride if r == 0 else 1
            c_exp = bin_ * expand
            c_sq = max(1, bin_ // 4)
            blk = {"cfg": {"k": k, "s": bstride,
                           "use_res": (bstride == 1 and bin_ == c_out)}}
            if expand != 1:
                blk["expand"] = conv1x1_bn(bin_, c_exp)
            blk["dw"] = dw_bn(k, c_exp)
            w1, b1 = linear(c_exp, c_sq, pad_in=_cp(c_exp))
            w2, b2 = linear(c_sq, c_exp, pad_out=_cp(c_exp))
            blk["se"] = {"w1": w1, "b1": b1, "w2": w2, "b2": b2}
            blk["proj"] = conv1x1_bn(c_exp, c_out)
            blocks.append(blk)
    params["blocks"] = blocks

    params["head"] = conv1x1_bn(320, HEAD_CH)
    cw, cb = linear(HEAD_CH, num_classes)
    params["cls"] = {"w": cw, "b": cb}
    return params


def _im2col(x, k, stride, pad):
    N, H, W, C = x.shape
    x_p = jnp.pad(x, ((0, 0), (pad, pad), (pad, pad), (0, 0)))
    Ho = (H + 2 * pad - k) // stride + 1
    Wo = (W + 2 * pad - k) // stride + 1
    cols = []
    for i in range(k):
        for j in range(k):
            cols.append(x_p[:, i:i + stride * Ho:stride,
                            j:j + stride * Wo:stride, :])
    return jnp.concatenate(cols, axis=-1)  # (N, Ho, Wo, k*k*C)


def _mbconv(p, x):
    N, H, W, Cin_p = x.shape
    cfg = p["cfg"]
    k, s, use_res = cfg["k"], cfg["s"], cfg["use_res"]
    inp = x

    h = x
    if "expand" in p:
        h = matmul_bias_act(h.reshape(-1, Cin_p), p["expand"]["w"],
                            p["expand"]["b"], act="silu")
        h = h.reshape(N, H, W, -1)
    Cexp_p = h.shape[-1]

    # depthwise conv + BN + SiLU; stride handled in-kernel, SE pool fused.
    h, pooled = dwconv_bn_silu(h, p["dw"]["w"], p["dw"]["b"], k, s)
    Ho, Wo = h.shape[1], h.shape[2]

    # SE FCs (M = batch: plain XLA per perf review; kept in f32).
    s1 = jax.nn.silu(pooled @ p["se"]["w1"] + p["se"]["b1"])
    s2 = jax.nn.sigmoid(s1 @ p["se"]["w2"] + p["se"]["b2"])   # (N, Cexp_p)

    # projection 1x1 conv + BN with SE scale and residual fused in.
    res = inp.reshape(N, H * W, Cin_p) if use_res else None
    out = proj_matmul(h.reshape(N, Ho * Wo, Cexp_p), s2,
                      p["proj"]["w"], p["proj"]["b"], res)
    return out.reshape(N, Ho, Wo, -1)


def forward(params, x_nchw):
    """Matches EfficientNetB6.forward: returns (logits, {})."""
    x = jnp.transpose(x_nchw.astype(jnp.float32), (0, 2, 3, 1))  # NCHW -> NHWC

    # stem (3x3 s2 conv via im2col + Pallas matmul)
    patches = _im2col(x, k=3, stride=2, pad=1)
    N, Ho, Wo, Kc = patches.shape
    y = matmul_bias_act(patches.reshape(-1, Kc), params["stem"]["w"],
                        params["stem"]["b"], act="silu")
    x = y.reshape(N, Ho, Wo, -1)

    for blk in params["blocks"]:
        x = _mbconv(blk, x)

    # head 1x1 conv + BN + SiLU
    N, H, W, Cp = x.shape
    y = matmul_bias_act(x.reshape(-1, Cp), params["head"]["w"],
                        params["head"]["b"], act="silu")
    y = y.reshape(N, H, W, HEAD_CH)

    pooled = jnp.mean(y.astype(jnp.float32), axis=(1, 2))  # global avg pool
    # TODO(synk): Dropout(p=0.2) before the classifier is identity in eval mode.
    logits = pooled @ params["cls"]["w"] + params["cls"]["b"]  # tiny M: XLA
    return logits, {}


if __name__ == "__main__":
    key = jax.random.PRNGKey(0)
    x = jax.random.normal(key, (2, 3, 64, 64), jnp.float32)  # NCHW like PyTorch
    params = init_params(seed=0, num_classes=1000)

    logits, aux = forward(params, x)
    logits = jax.block_until_ready(logits)
    assert logits.shape == (2, 1000), logits.shape
    assert isinstance(aux, dict) and not aux
    print("KERNEL_OK")
</pallas_src>

<mosaic_0001>
module attributes {stable_mosaic.version = 11 : i64} {
  func.func @_mm_kernel(%arg0: i32, %arg1: memref<256x32xbf16, #tpu.memory_space<vmem>>, %arg2: memref<32x128xbf16, #tpu.memory_space<vmem>>, %arg3: memref<1x128xf32, #tpu.memory_space<vmem>>, %arg4: memref<256x128xbf16, #tpu.memory_space<vmem>>) attributes {dimension_semantics = [#tpu.dimension_semantics<parallel>], iteration_bounds = array<i64: 8>, scalar_prefetch = 0 : i64, scratch_operands = 0 : i64, tpu.core_type = #tpu.core_type<tc>, window_params = [{transform_indices = @transform_0, window_bounds = array<i64: 256, 32>}, {pipeline_mode = #tpu.pipeline_mode<synchronous>, transform_indices = @transform_1, window_bounds = array<i64: 32, 128>}, {pipeline_mode = #tpu.pipeline_mode<synchronous>, transform_indices = @transform_2, window_bounds = array<i64: 1, 128>}, {transform_indices = @transform_3, window_bounds = array<i64: 256, 128>}]} {
    %c0 = arith.constant 0 : index
    %c0_0 = arith.constant 0 : index
    %0 = vector.load %arg1[%c0, %c0_0] : memref<256x32xbf16, #tpu.memory_space<vmem>>, vector<256x32xbf16>
    %c0_1 = arith.constant 0 : index
    %c0_2 = arith.constant 0 : index
    %1 = vector.load %arg2[%c0_1, %c0_2] : memref<32x128xbf16, #tpu.memory_space<vmem>>, vector<32x128xbf16>
    %cst = arith.constant dense<0.000000e+00> : vector<256x128xf32>
    %2 = tpu.matmul %0, %1, %cst {dimension_numbers = #tpu.dot_dimension_numbers<[1], [0], [0], [1], [0, 0, 1, 1], [], []>} : vector<256x32xbf16>, vector<32x128xbf16>, vector<256x128xf32> -> vector<256x128xf32>
    %c0_3 = arith.constant 0 : index
    %c0_4 = arith.constant 0 : index
    %3 = vector.load %arg3[%c0_3, %c0_4] : memref<1x128xf32, #tpu.memory_space<vmem>>, vector<1x128xf32>
    %4 = vector.broadcast %3 : vector<1x128xf32> to vector<256x128xf32>
    %5 = arith.addf %2, %4 : vector<256x128xf32>
    %6 = arith.negf %5 : vector<256x128xf32>
    %7 = math.exp %6 : vector<256x128xf32>
    %cst_5 = arith.constant 1.000000e+00 : f32
    %8 = vector.broadcast %cst_5 : f32 to vector<256x128xf32>
    %9 = arith.addf %8, %7 : vector<256x128xf32>
    %10 = arith.divf %8, %9 : vector<256x128xf32>
    %11 = arith.mulf %5, %10 : vector<256x128xf32>
    %12 = arith.truncf %11 : vector<256x128xf32> to vector<256x128xbf16>
    %c0_6 = arith.constant 0 : index
    %c0_7 = arith.constant 0 : index
    %13 = vector.load %arg4[%c0_6, %c0_7] : memref<256x128xbf16, #tpu.memory_space<vmem>>, vector<256x128xbf16>
    tpu.vector_store %arg4[%c0_6, %c0_7], %12 {strides = array<i32>} : memref<256x128xbf16, #tpu.memory_space<vmem>>, vector<256x128xbf16>,
    return
  }
  func.func @transform_0(%arg0: i32) -> (i32, i32) {
    %c0_i32 = arith.constant 0 : i32
    %c0_i32_0 = arith.constant 0 : i32
    return %arg0, %c0_i32 : i32, i32
  }
  func.func @transform_1(%arg0: i32) -> (i32, i32) {
    %c0_i32 = arith.constant 0 : i32
    %c0_i32_0 = arith.constant 0 : i32
    %c0_i32_1 = arith.constant 0 : i32
    return %c0_i32, %c0_i32_0 : i32, i32
  }
  func.func @transform_2(%arg0: i32) -> (i32, i32) {
    %c0_i32 = arith.constant 0 : i32
    %c0_i32_0 = arith.constant 0 : i32
    %c0_i32_1 = arith.constant 0 : i32
    return %c0_i32, %c0_i32_0 : i32, i32
  }
  func.func @transform_3(%arg0: i32) -> (i32, i32) {
    %c0_i32 = arith.constant 0 : i32
    %c0_i32_0 = arith.constant 0 : i32
    return %arg0, %c0_i32 : i32, i32
  }
}

</mosaic_0001>

<bundles_post_ra>
// kernel: tpu_custom_call.1
= control target key start
LH: loop header
LB: loop body
LE: loop exit
PB: predicated region body
PF: predicated region fallthrough
CT: control target
= control target key end

     0   :  { %8 = vsyncpa [#allocation3], 0  ;;  %s1909_s0 = inlined_call_operand.vmem [shape: bf16[2048,32], index: 0, kind: input, shape index: {}]   ;;  %s1910_s1 = inlined_call_operand.vmem [shape: bf16[32,128], index: 1, kind: input, shape index: {}]   ;;  %s1911_s2 = inlined_call_operand.vmem [shape: f32[1,128], index: 2, kind: input, shape index: {}]   ;;  %s1912_s3 = inlined_call_operand.hbm [shape: bf16[2048,128], index: 3, kind: output, shape index: {}]  }
   0x1   :  { %10 = vsyncpa [#allocation3 + $0x1], 0  ;;  %s1549_s12 = smov 0   ;;  %s1551_s13 = smov 0  }
   0x2   :  { %s1553_s14 = smov 0   ;;  %s1555_s15 = smov 0  }
   0x3 LB: > { %s1570_s16 = sadd.s32 4294967295, %s1524_s15   ;;  %s978_s17 = sadd.s32 4294967294, %s1524_s15   ;;  %s1524_s15 = sphi %s1555_s15, %s1918_s15   ;;  %s1520_s14 = sphi %s1553_s14, %s1917_s14   ;;  %s1516_s13 = sphi %s1551_s13, %s1916_s13   ;;  %s1512_s12 = sphi %s1549_s12, %s1915_s12  }
   0x4   : > { %s1574_s18 = sadd.s32 1, %s1524_s15   ;;  %s91_s19 = sadd.s32 1, %s1520_s14 }
   0x5   : > { %s88_s20 = ssub.s32 %s1524_s15, %s1574_s18  ;;  %p101_p0 = scmp.ne.s32.totalorder %s1520_s14, %s1516_s13 }
   0x6   : > { %p89_p1 = scmp.eq.s32.totalorder %s88_s20, 0  ;;  %p102_p2 = scmp.eq.s32.totalorder %s1570_s16, 7 }
   0x7   : > { %p107_p3 = scmp.ne.s32.totalorder %s1516_s13, %s1512_s12  ;;  %p108_p4 = scmp.eq.s32.totalorder %s978_s17, 7 }
   0x8   : > { %s1585_s21 = scalar_select %p89_p1, %s1520_s14, %s91_s19  }
   0x9   : > { %p1587_p5 = por %p102_p2, %p101_p0  ;;  %p1591_p6 = por %p108_p4, %p107_p3 }
   0xa   : > { %p981_p7 = scmp.ge.s32.totalorder %s1524_s15, 1  ;;  %p141_p8 = scmp.lt.s32.totalorder %s1524_s15, 9 }
   0xc   : > { %p142_p9 = pnand %p981_p7, %p141_p8 }
   0xd   : > { %v1316_v0 = vld [vmem:[%s1910_s1] sm:$0xff] (!%p142_p9)   ;;  %s983_s26 = sshll.u32 (!%p142_p9), %s1570_s16, 5  ;;  %v1317_v1 = vld [vmem:[%s1910_s1 + $0x8] sm:$0xff] (!%p142_p9)   ;;  %vm308_vm0 = vcmask (!%p142_p9), 261120   ;;  %s162_s8 = sand.u32 (!%p142_p9), 1, %s1516_s13  }
   0xe   : > { %145 = sbr.rel (%p142_p9) target bundleno = 342 (0x156), region = 32  ;;  %p166_p10 = scmp.lt.s32.totalorder (!%p142_p9), %s983_s26, 255  ;;  %1235 = vmatprep.subr.bf16.mxu0 (!%p142_p9), %v1316_v0  ;;  %1271 = vmatprep.subr.bf16.mxu1 (!%p142_p9), %v1316_v0  ;;  %v1644_v18 = vld [vmem:[%s1911_s2] ss:$0 sm:$0xff] (!%p142_p9) }
   0xf   : > { %1236 = vmatpush3.bf16.msra.mxu0 (!%p142_p9), %v1316_v0  ;;  %1273 = vmatpush3.bf16.msra.mxu1 (!%p142_p9), %v1316_v0  ;;  %s1746_s9 = sshll.u32 (!%p142_p9), %s162_s8, 7  ;;  %s1121_s11 = sshll.u32 (!%p142_p9), %s1570_s16, 11 }
  0x10   : > { %1237 = vmatprep.subr.bf16.mxu0 (!%p142_p9), %v1317_v1  ;;  %1272 = vmatprep.subr.bf16.mxu1 (!%p142_p9), %v1317_v1  ;;  %s1775_s10 = scalar_lea.vmem (!%p142_p9), [#allocation2], %s1746_s9  ;;  %s1859_s16 = scalar_lea.hbm (!%p142_p9), %s1912_s3, %s1121_s11 }
  0x11   : > { %s916_s17 = sshll.u32 (!%p142_p9), %s1775_s10, 4  ;;  %s1868_s24 = scalar_lea.sflag (!%p142_p9), [#allocation3], %s162_s8  ;;  %s1861_s17 = int_to_ptr.vmem [resolvable:$true] %s916_s17 }
  0x12   : > { %s1462_s25 = scalar_lea.vmem (!%p142_p9), %s1861_s17, 2048 }
  0x13   : > { %1238 = vmatpush3.bf16.msra.mxu0 (!%p142_p9), %v1317_v1  ;;  %1274 = vmatpush3.bf16.msra.mxu1 (!%p142_p9), %v1317_v1  ;;  %p1463_p11 = scmp.ne.s32.totalorder (!%p142_p9), %s1861_s17, %s1462_s25 }
  0x15   : > { %s1920_s26 = smov (!%p166_p10, %s983_s26), 255  ;;  %p1464_p12 = pnand %p1463_p11, %p1587_p5 }
  0x16   : > { %s984_s29 = sshll.u32 %s1920_s26, 2  ;;  %s1526_s26 = smov [#allocation2]  }
  0x17   : > { %s1607_s5 = scalar_lea.vmem %s1909_s0, %s984_s29  ;;  %p1465_p13 = pneg %p1464_p12 }
  0x18   : > { %v1318_v2 = vld [vmem:[%s1607_s5] sm:$0xff]   ;;  %v1320_v4 = vld [vmem:[%s1607_s5 + $0x8] sm:$0xff]   ;;  %v1322_v6 = vld [vmem:[%s1607_s5 + $0x10] sm:$0xff]   ;;  %s1466_s27 = sshll.u32 %s1526_s26, 4  ;;  %s1467_s27 = int_to_ptr.vmem [resolvable:$false] %s1466_s27 }
  0x19   : > { %v1319_v3 = vld [vmem:[%s1607_s5 + $0x40] sm:$0xff]   ;;  %1239 = vmatprep.mubr.msk.bf16.mxu0 %vm308_vm0, %v1318_v2  ;;  %v1321_v5 = vld [vmem:[%s1607_s5 + $0x48] sm:$0xff]   ;;  %v1323_v7 = vld [vmem:[%s1607_s5 + $0x50] sm:$0xff]   ;;  %s1468_s28 = scalar_lea.vmem %s1467_s27, 4096  ;;  %p1469_p0 = scmp.lt.s32.totalorder %s1861_s17, %s1467_s27 }
  0x1a   : > { %1255 = vmatprep.mubr.msk.bf16.mxu1 %vm308_vm0, %v1319_v3  ;;  %1240 = vmatmul.mubr.msk.bf16.vlgmr.msra.gmra.mrb[0].mxu0 %vm308_vm0, %v1320_v4  ;;  %v1324_v8 = vld [vmem:[%s1607_s5 + $0x18] sm:$0xff]   ;;  %v1326_v10 = vld [vmem:[%s1607_s5 + $0x20] sm:$0xff]   ;;  %v1328_v12 = vld [vmem:[%s1607_s5 + $0x28] sm:$0xff]   ;;  %p1470_p1 = scmp.lt.s32.totalorder %s1468_s28, %s1462_s25 }
  0x1b   : > { %1256 = vmatmul.mubr.msk.bf16.vlgmr.msra.gmra.mrb[0].mxu1 %vm308_vm0, %v1321_v5  ;;  %1243 = vmatprep.mubr.msk.bf16.mxu0 %vm308_vm0, %v1322_v6  ;;  %v1325_v9 = vld [vmem:[%s1607_s5 + $0x58] sm:$0xff]   ;;  %v1327_v11 = vld [vmem:[%s1607_s5 + $0x60] sm:$0xff]   ;;  %v1329_v13 = vld [vmem:[%s1607_s5 + $0x68] sm:$0xff]  }
  0x1c   : > { %1259 = vmatprep.mubr.msk.bf16.mxu1 %vm308_vm0, %v1323_v7  ;;  %v1330_v14 = vld [vmem:[%s1607_s5 + $0x30] sm:$0xff]   ;;  %v1332_v16 = vld [vmem:[%s1607_s5 + $0x38] sm:$0xff]   ;;  %p1471_p2 = por %p1470_p1, %p1469_p0 }
  0x1d   : > { %v1331_v15 = vld [vmem:[%s1607_s5 + $0x70] sm:$0xff]   ;;  %v1333_v17 = vld [vmem:[%s1607_s5 + $0x78] sm:$0xff]  }
  0x1e   : > { %p1472_p3 = pnand %p1471_p2, %p1465_p13 }
  0x22   : > { %1244 = vmatmul.mubr.msk.bf16.gmra.mrb[4].mxu0 %vm308_vm0, %v1324_v8 }
  0x23   : > { %1260 = vmatmul.mubr.msk.bf16.gmra.mrb[4].mxu1 %vm308_vm0, %v1325_v9  ;;  %1247 = vmatprep.mubr.msk.bf16.mxu0 %vm308_vm0, %v1326_v10 }
  0x24   : > { %1263 = vmatprep.mubr.msk.bf16.mxu1 %vm308_vm0, %v1327_v11 }
  0x2a   : > { %1248 = vmatmul.mubr.msk.bf16.gmra.mrb[8].mxu0 %vm308_vm0, %v1328_v12 }
  0x2b   : > { %1264 = vmatmul.mubr.msk.bf16.gmra.mrb[8].mxu1 %vm308_vm0, %v1329_v13  ;;  %1251 = vmatprep.mubr.msk.bf16.mxu0 %vm308_vm0, %v1330_v14 }
  0x2c   : > { %1267 = vmatprep.mubr.msk.bf16.mxu1 %vm308_vm0, %v1331_v15 }
  0x32   : > { %1252 = vmatmul.mubr.msk.bf16.gmra.mrb[12].mxu0 %vm308_vm0, %v1332_v16 }
  0x33   : > { %1268 = vmatmul.mubr.msk.bf16.gmra.mrb[12].mxu1 %vm308_vm0, %v1333_v17 }
  0xed   : > { %v1241_v19 = vpop.f32.mrb[0].mxu0 }
  0xee   : > { %v1647_v20 = vadd.f32 %v1241_v19, %v1644_v18  ;;  %v1257_v21 = vpop.f32.mrb[0].mxu1  ;;  %v391_v22 = vpop.f32.mrb[1].mxu0 }
  0xef   : > { %v1650_v23 = vadd.f32 %v1257_v21, %v1644_v18  ;;  %v1653_v24 = vadd.f32 %v1644_v18, %v391_v22  ;;  %v455_v25 = vpop.f32.mrb[1].mxu1  ;;  %v1242_v26 = vpop.f32.mrb[2].mxu0 }
  0xf0   : > { %v1022_v27 = vmul.f32 -1.442695, %v1647_v20  ;;  %v1657_v28 = vadd.f32 %v1644_v18, %v455_v25  ;;  %v1660_v29 = vadd.f32 %v1242_v26, %v1644_v18  ;;  %v1258_v30 = vpop.f32.mrb[2].mxu1  ;;  %v394_v31 = vpop.f32.mrb[3].mxu0 }
  0xf1   : > { %v1038_v32 = vmul.f32 -1.442695, %v1650_v23  ;;  %v1020_v33 = vmul.f32 -1.442695, %v1653_v24  ;;  %v1665_v34 = vadd.f32 %v1258_v30, %v1644_v18  ;;  %v1668_v35 = vadd.f32 %v1644_v18, %v394_v31  ;;  %v458_v36 = vpop.f32.mrb[3].mxu1 }
  0xf2   : > { %1334 = vpow2.f32 %v1022_v27  ;;  %v1036_v37 = vmul.f32 -1.442695, %v1657_v28  ;;  %v1023_v38 = vmul.f32 -1.442695, %v1660_v29  ;;  %v1673_v39 = vadd.f32 %v1644_v18, %v458_v36 }
  0xf3   : > { %1336 = vpow2.f32 %v1038_v32  ;;  %v1039_v40 = vmul.f32 -1.442695, %v1665_v34  ;;  %v1021_v41 = vmul.f32 -1.442695, %v1668_v35 }
  0xf4   : > { %1338 = vpow2.f32 %v1020_v33  ;;  %v1037_v42 = vmul.f32 -1.442695, %v1673_v39 }
  0xf5   : > { %1340 = vpow2.f32 %v1036_v37  ;;  %v1245_v43 = vpop.f32.mrb[4].mxu0 }
  0xf6   : > { %1342 = vpow2.f32 %v1023_v38  ;;  %v1679_v44 = vadd.f32 %v1245_v43, %v1644_v18  ;;  %v1261_v45 = vpop.f32.mrb[4].mxu1  ;;  %v407_v46 = vpop.f32.mrb[5].mxu0 }
  0xf7   : > { %1344 = vpow2.f32 %v1039_v40  ;;  %v1682_v47 = vadd.f32 %v1261_v45, %v1644_v18  ;;  %v1685_v48 = vadd.f32 %v1644_v18, %v407_v46  ;;  %v471_v49 = vpop.f32.mrb[5].mxu1  ;;  %v1246_v50 = vpop.f32.mrb[6].mxu0 }
  0xf8   : > { %1346 = vpow2.f32 %v1021_v41  ;;  %v1026_v51 = vmul.f32 -1.442695, %v1679_v44  ;;  %v1689_v52 = vadd.f32 %v1644_v18, %v471_v49  ;;  %v1692_v53 = vadd.f32 %v1246_v50, %v1644_v18  ;;  %v1262_v54 = vpop.f32.mrb[6].mxu1  ;;  %v410_v55 = vpop.f32.mrb[7].mxu0 }
  0xf9   : > { %1348 = vpow2.f32 %v1037_v42  ;;  %v1042_v56 = vmul.f32 -1.442695, %v1682_v47  ;;  %v1024_v57 = vmul.f32 -1.442695, %v1685_v48  ;;  %v474_v58 = vpop.f32.mrb[7].mxu1  ;;  %v1699_v15 = vadd.f32 %v1262_v54, %v1644_v18 }
  0xfa   : > { %1350 = vpow2.f32 %v1026_v51  ;;  %v1040_v59 = vmul.f32 -1.442695, %v1689_v52  ;;  %v1027_v60 = vmul.f32 -1.442695, %v1692_v53  ;;  %v1702_v21 = vadd.f32 %v1644_v18, %v410_v55 }
  0xfb   : > { %1352 = vpow2.f32 %v1042_v56  ;;  %v1043_v32 = vmul.f32 -1.442695, %v1699_v15  ;;  %v1706_v33 = vadd.f32 %v1644_v18, %v474_v58 }
  0xfc   : > { %v1335_v61 = vpop.eup %1334  ;;  %1354 = vpow2.f32 %v1024_v57  ;;  %v1025_v40 = vmul.f32 -1.442695, %v1702_v21 }
  0xfd   : > { %v1337_v62 = vpop.eup %1336  ;;  %v616_v63 = vadd.f32 1.0, %v1335_v61  ;;  %1356 = vpow2.f32 %v1040_v59  ;;  %v1249_v0 = vpop.f32.mrb[8].mxu0 }
  0xfe   : > { %v1339_v1 = vpop.eup %1338  ;;  %v632_v2 = vadd.f32 1.0, %v1337_v62  ;;  %1358 = vpow2.f32 %v1027_v60  ;;  %v1265_v3 = vpop.f32.mrb[8].mxu1  ;;  %v1710_v41 = vadd.f32 %v1249_v0, %v1644_v18 }
  0xff   : > { %v423_v4 = vpop.f32.mrb[9].mxu0  ;;  %v1341_v5 = vpop.eup %1340  ;;  %1360 = vrcp.f32 %v616_v63  ;;  %v614_v6 = vadd.f32 1.0, %v1339_v1  ;;  %v1715_v49 = vadd.f32 %v1265_v3, %v1644_v18  ;;  %v1041_v3 = vmul.f32 -1.442695, %v1706_v33 }
 0x100   : > { %v487_v7 = vpop.f32.mrb[9].mxu1  ;;  %v1250_v8 = vpop.f32.mrb[10].mxu0  ;;  %1362 = vrcp.f32 %v632_v2  ;;  %v630_v10 = vadd.f32 1.0, %v1341_v5  ;;  %v1718_v50 = vadd.f32 %v1644_v18, %v423_v4  ;;  %v1030_v5 = vmul.f32 -1.442695, %v1710_v41 }
 0x101   : > { %v1343_v9 = vpop.eup %1342  ;;  %v1266_v11 = vpop.f32.mrb[10].mxu1  ;;  %1364 = vrcp.f32 %v614_v6  ;;  %v1726_v57 = vadd.f32 %v1644_v18, %v487_v7  ;;  %v1729_v58 = vadd.f32 %v1250_v8, %v1644_v18  ;;  %v1046_v6 = vmul.f32 -1.442695, %v1715_v49 }
 0x102   : > { %v426_v12 = vpop.f32.mrb[11].mxu0  ;;  %v1345_v13 = vpop.eup %1344  ;;  %v617_v14 = vadd.f32 1.0, %v1343_v9  ;;  %1366 = vrcp.f32 %v630_v10  ;;  %v1736_v63 = vadd.f32 %v1266_v11, %v1644_v18  ;;  %v1028_v8 = vmul.f32 -1.442695, %v1718_v50 }
 0x103   : > { %v490_v16 = vpop.f32.mrb[11].mxu1  ;;  %v1347_v17 = vpop.eup %1346  ;;  %v633_v19 = vadd.f32 1.0, %v1345_v13  ;;  %v1739_v0 = vadd.f32 %v1644_v18, %v426_v12  ;;  %v1044_v9 = vmul.f32 -1.442695, %v1726_v57  ;;  %v1031_v10 = vmul.f32 -1.442695, %v1729_v58 }
 0x104   : > { %v1349_v22 = vpop.eup %1348  ;;  %1368 = vrcp.f32 %v617_v14  ;;  %v615_v25 = vadd.f32 1.0, %v1347_v17  ;;  %v1047_v12 = vmul.f32 -1.442695, %v1736_v63  ;;  %v1756_v14 = vadd.f32 %v1644_v18, %v490_v16 }
 0x105   : > { %v1351_v26 = vpop.eup %1350  ;;  %1370 = vrcp.f32 %v633_v19  ;;  %v631_v27 = vadd.f32 1.0, %v1349_v22  ;;  %v1253_v36 = vpop.f32.mrb[12].mxu0  ;;  %v1029_v13 = vmul.f32 -1.442695, %v1739_v0 }
 0x106   : > { %v1353_v30 = vpop.eup %1352  ;;  %1372 = vrcp.f32 %v615_v25  ;;  %v620_v31 = vadd.f32 1.0, %v1351_v26  ;;  %v1269_v42 = vpop.f32.mrb[12].mxu1  ;;  %v1761_v25 = vadd.f32 %v1253_v36, %v1644_v18 }
 0x107   : > { %v1355_v37 = vpop.eup %1354  ;;  %1374 = vrcp.f32 %v631_v27  ;;  %v636_v38 = vadd.f32 1.0, %v1353_v30  ;;  %v1712_v43 = vpop.f32.mrb[13].mxu0 }
 0x108   : > { %v1357_v45 = vpop.eup %1356  ;;  %1376 = vrcp.f32 %v620_v31  ;;  %v618_v46 = vadd.f32 1.0, %v1355_v37  ;;  %v1720_v51 = vpop.f32.mrb[13].mxu1  ;;  %v1766_v31 = vadd.f32 %v1269_v42, %v1644_v18 }
 0x109   : > { %v1722_v54 = vpop.f32.mrb[14].mxu0  ;;  %v1359_v55 = vpop.eup %1358  ;;  %1378 = vrcp.f32 %v636_v38  ;;  %v634_v56 = vadd.f32 1.0, %v1357_v45 }
 0x10a   : > { %v1731_v59 = vpop.f32.mrb[14].mxu1  ;;  %v1733_v60 = vpop.f32.mrb[15].mxu0  ;;  %1380 = vrcp.f32 %v618_v46  ;;  %v621_v62 = vadd.f32 1.0, %v1359_v55  ;;  %v1050_v45 = vmul.f32 -1.442695, %v1766_v31 }
 0x10b   : > { %v1361_v61 = vpop.eup %1360  ;;  %v1741_v1 = vpop.f32.mrb[15].mxu1  ;;  %1382 = vrcp.f32 %v634_v56 }
 0x10c   : > { %v1363_v2 = vpop.eup %1362  ;;  %1384 = vrcp.f32 %v621_v62  ;;  %v712_v19 = vmul.f32 %v1361_v61, %v1647_v20 }
 0x10d   : > { %v1365_v4 = vpop.eup %1364  ;;  %1386 = vpow2.f32 %v1043_v32  ;;  %v728_v27 = vmul.f32 %v1363_v2, %v1650_v23 }
 0x10e   : > { %v1367_v7 = vpop.eup %1366  ;;  %1388 = vpow2.f32 %v1025_v40  ;;  %v710_v32 = vmul.f32 %v1365_v4, %v1653_v24 }
 0x10f   : > { %v1369_v11 = vpop.eup %1368  ;;  %1390 = vpow2.f32 %v1041_v3  ;;  %v726_v36 = vmul.f32 %v1367_v7, %v1657_v28 }
 0x110   : > { %v1371_v17 = vpop.eup %1370  ;;  %v713_v22 = vmul.f32 %v1369_v11, %v1660_v29  ;;  %1392 = vpow2.f32 %v1030_v5 }
 0x111   : > { %v1373_v26 = vpop.eup %1372  ;;  %v729_v30 = vmul.f32 %v1371_v17, %v1665_v34  ;;  %1394 = vpow2.f32 %v1046_v6  ;;  %v1045_v34 = vmul.f32 -1.442695, %v1756_v14 }
 0x112   : > { %v1375_v16 = vpop.eup %1374  ;;  %v1130_v20 = vpack.c.bf16 %v713_v22, %v712_v19  ;;  %v711_v29 = vmul.f32 %v1373_v26, %v1668_v35  ;;  %1396 = vpow2.f32 %v1028_v8  ;;  %v1793_v22 = vadd.f32 %v1644_v18, %v1712_v43 }
 0x113   : > { %v1377_v37 = vpop.eup %1376  ;;  %v1170_v38 = vpack.c.bf16 %v729_v30, %v728_v27  ;;  %v727_v40 = vmul.f32 %v1375_v16, %v1673_v39  ;;  %1398 = vpow2.f32 %v1044_v9  ;;  %v1034_v39 = vmul.f32 -1.442695, %v1761_v25 }
 0x114   : > { %v1772_v23 = vpop.eup %1378  ;;  %1202 = vst [vmem:[%s1775_s10 + $0x8] sm:$0xff] %v1130_v20   ;;  %v1125_v24 = vpack.c.bf16 %v711_v29, %v710_v32  ;;  %1400 = vpow2.f32 %v1031_v10  ;;  %v716_v56 = vmul.f32 %v1377_v37, %v1679_v44  ;;  %v1797_v30 = vadd.f32 %v1644_v18, %v1720_v51 }
 0x115   : > { %v1779_v35 = vpop.eup %1380  ;;  %1210 = vst [vmem:[%s1775_s10 + $0x48] sm:$0xff] %v1170_v38   ;;  %v1165_v28 = vpack.c.bf16 %v727_v40, %v726_v36  ;;  %1402 = vpow2.f32 %v1047_v12  ;;  %v1801_v20 = vadd.f32 %v1722_v54, %v1644_v18  ;;  %v1805_v43 = vadd.f32 %v1731_v59, %v1644_v18 }
 0x116   : > { %v1783_v42 = vpop.eup %1382  ;;  %1126 = vst [vmem:[%s1775_s10] sm:$0xff] %v1125_v24   ;;  %1404 = vpow2.f32 %v1029_v13  ;;  %v1809_v36 = vadd.f32 %v1644_v18, %v1733_v60  ;;  %v1032_v38 = vmul.f32 -1.442695, %v1793_v22  ;;  %v1048_v54 = vmul.f32 -1.442695, %v1797_v30 }
 0x117   : > { %v1385_v46 = vpop.eup %1384  ;;  %1209 = vst [vmem:[%s1775_s10 + $0x40] sm:$0xff] %v1165_v28   ;;  %1406 = vpow2.f32 %v1045_v34  ;;  %v1815_v24 = vadd.f32 %v1644_v18, %v1741_v1  ;;  %v732_v59 = vmul.f32 %v1772_v23, %v1682_v47  ;;  %v1035_v60 = vmul.f32 -1.442695, %v1801_v20 }
 0x118   : > { %v1387_v55 = vpop.eup %1386  ;;  %v717_v61 = vmul.f32 %v1385_v46, %v1692_v53  ;;  %1408 = vpow2.f32 %v1034_v39  ;;  %v1033_v18 = vmul.f32 -1.442695, %v1809_v36  ;;  %v730_v47 = vmul.f32 %v1783_v42, %v1689_v52 }
 0x119   : > { %v1389_v62 = vpop.eup %1388  ;;  %v637_v2 = vadd.f32 1.0, %v1387_v55  ;;  %1410 = vpow2.f32 %v1050_v45  ;;  %v714_v45 = vmul.f32 %v1779_v35, %v1685_v48  ;;  %v1051_v55 = vmul.f32 -1.442695, %v1805_v43 }
 0x11a   : > { %v1391_v3 = vpop.eup %1390  ;;  %v1140_v4 = vpack.c.bf16 %v717_v61, %v716_v56  ;;  %v619_v5 = vadd.f32 1.0, %v1389_v62  ;;  %v1049_v48 = vmul.f32 -1.442695, %v1815_v24 }
 0x11b   : > { %v1393_v6 = vpop.eup %1392  ;;  %1412 = vrcp.f32 %v637_v2  ;;  %v635_v7 = vadd.f32 1.0, %v1391_v3 }
 0x11c   : > { %v1395_v8 = vpop.eup %1394  ;;  %1204 = vst [vmem:[%s1775_s10 + $0x18] sm:$0xff] %v1140_v4   ;;  %1414 = vrcp.f32 %v619_v5  ;;  %v624_v9 = vadd.f32 1.0, %v1393_v6 }
 0x11d   : > { %v1397_v10 = vpop.eup %1396  ;;  %1416 = vrcp.f32 %v635_v7  ;;  %v640_v44 = vadd.f32 1.0, %v1395_v8 }
 0x11e   : > { %v1399_v11 = vpop.eup %1398  ;;  %1418 = vrcp.f32 %v624_v9  ;;  %v622_v53 = vadd.f32 1.0, %v1397_v10 }
 0x11f   : > { %v1401_v12 = vpop.eup %1400  ;;  %1420 = vrcp.f32 %v640_v44  ;;  %v638_v13 = vadd.f32 1.0, %v1399_v11 }
 0x120   : > { %v1403_v17 = vpop.eup %1402  ;;  %1422 = vrcp.f32 %v622_v53  ;;  %v625_v19 = vadd.f32 1.0, %v1401_v12 }
 0x121   : > { %v1405_v26 = vpop.eup %1404  ;;  %1424 = vrcp.f32 %v638_v13  ;;  %v641_v27 = vadd.f32 1.0, %v1403_v17 }
 0x122   : > { %v1407_v16 = vpop.eup %1406  ;;  %1426 = vrcp.f32 %v625_v19  ;;  %v623_v32 = vadd.f32 1.0, %v1405_v26 }
 0x123   : > { %v1409_v29 = vpop.eup %1408  ;;  %1428 = vrcp.f32 %v641_v27  ;;  %v639_v37 = vadd.f32 1.0, %v1407_v16 }
 0x124   : > { %v1411_v51 = vpop.eup %1410  ;;  %1430 = vrcp.f32 %v623_v32  ;;  %v628_v10 = vadd.f32 1.0, %v1409_v29 }
 0x125   : > { %v1413_v40 = vpop.eup %1412  ;;  %1432 = vrcp.f32 %v639_v37  ;;  %v644_v11 = vadd.f32 1.0, %v1411_v51 }
 0x126   : > { %v1415_v34 = vpop.eup %1414  ;;  %v733_v28 = vmul.f32 %v1413_v40, %v1699_v15  ;;  %1434 = vpow2.f32 %v1032_v38 }
 0x127   : > { %v1417_v39 = vpop.eup %1416  ;;  %v715_v46 = vmul.f32 %v1415_v34, %v1702_v21  ;;  %1436 = vpow2.f32 %v1048_v54 }
 0x128   : > { %v1419_v1 = vpop.eup %1418  ;;  %v1180_v15 = vpack.c.bf16 %v733_v28, %v732_v59  ;;  %v731_v23 = vmul.f32 %v1417_v39, %v1706_v33  ;;  %1438 = vpow2.f32 %v1035_v60 }
 0x129   : > { %v1421_v56 = vpop.eup %1420  ;;  %v1135_v61 = vpack.c.bf16 %v715_v46, %v714_v45  ;;  %1440 = vpow2.f32 %v1051_v55  ;;  %v720_v33 = vmul.f32 %v1419_v1, %v1710_v41 }
 0x12a   : > { %v1423_v21 = vpop.eup %1422  ;;  %1212 = vst [vmem:[%s1775_s10 + $0x58] sm:$0xff] %v1180_v15   ;;  %v1175_v35 = vpack.c.bf16 %v731_v23, %v730_v47  ;;  %1442 = vpow2.f32 %v1033_v18  ;;  %v736_v4 = vmul.f32 %v1421_v56, %v1715_v49 }
 0x12b   : > { %v1425_v62 = vpop.eup %1424  ;;  %1203 = vst [vmem:[%s1775_s10 + $0x10] sm:$0xff] %v1135_v61   ;;  %1444 = vpow2.f32 %v1049_v48  ;;  %v718_v7 = vmul.f32 %v1423_v21, %v1718_v50 }
 0x12c   : > { %v1427_v2 = vpop.eup %1426  ;;  %1211 = vst [vmem:[%s1775_s10 + $0x50] sm:$0xff] %v1175_v35   ;;  %v734_v41 = vmul.f32 %v1425_v62, %v1726_v57  ;;  %1446 = vrcp.f32 %v628_v10 }
 0x12d   : > { %v1429_v52 = vpop.eup %1428  ;;  %v721_v42 = vmul.f32 %v1427_v2, %v1729_v58  ;;  %1448 = vrcp.f32 %v644_v11 }
 0x12e   : > { %v1431_v3 = vpop.eup %1430  ;;  %v737_v5 = vmul.f32 %v1429_v52, %v1736_v63 }
 0x12f   : > { %v1433_v6 = vpop.eup %1432  ;;  %v1150_v8 = vpack.c.bf16 %v721_v42, %v720_v33  ;;  %v719_v9 = vmul.f32 %v1431_v3, %v1739_v0 }
 0x130   : > { %v1190_v44 = vpack.c.bf16 %v737_v5, %v736_v4  ;;  %v735_v58 = vmul.f32 %v1433_v6, %v1756_v14  ;;  %v1435_v49 = vpop.eup %1434 }
 0x131   : > { %1206 = vst [vmem:[%s1775_s10 + $0x28] sm:$0xff] %v1150_v8   ;;  %v1145_v53 = vpack.c.bf16 %v719_v9, %v718_v7  ;;  %v1437_v12 = vpop.eup %1436  ;;  %v626_v50 = vadd.f32 1.0, %v1435_v49 }
 0x132   : > { %1214 = vst [vmem:[%s1775_s10 + $0x68] sm:$0xff] %v1190_v44   ;;  %v1185_v63 = vpack.c.bf16 %v735_v58, %v734_v41  ;;  %v1439_v13 = vpop.eup %1438  ;;  %v642_v0 = vadd.f32 1.0, %v1437_v12 }
 0x133   : > { %1205 = vst [vmem:[%s1775_s10 + $0x20] sm:$0xff] %v1145_v53   ;;  %v1441_v17 = vpop.eup %1440  ;;  %1450 = vrcp.f32 %v626_v50  ;;  %v629_v57 = vadd.f32 1.0, %v1439_v13 }
 0x134   : > { %1213 = vst [vmem:[%s1775_s10 + $0x60] sm:$0xff] %v1185_v63   ;;  %v1443_v19 = vpop.eup %1442  ;;  %1452 = vrcp.f32 %v642_v0  ;;  %v645_v14 = vadd.f32 1.0, %v1441_v17 }
 0x135   : > { %v1445_v26 = vpop.eup %1444  ;;  %1454 = vrcp.f32 %v629_v57  ;;  %v627_v27 = vadd.f32 1.0, %v1443_v19 }
 0x136   : > { %1456 = vrcp.f32 %v645_v14  ;;  %v643_v16 = vadd.f32 1.0, %v1445_v26  ;;  %v1447_v32 = vpop.eup %1446 }
 0x137   : > { %1458 = vrcp.f32 %v627_v27  ;;  %v1449_v29 = vpop.eup %1448  ;;  %v724_v54 = vmul.f32 %v1447_v32, %v1761_v25 }
 0x138   : > { %1460 = vrcp.f32 %v643_v16  ;;  %v740_v28 = vmul.f32 %v1449_v29, %v1766_v31 }
 0x13d   : > { %v1451_v37 = vpop.eup %1450 }
 0x13e   : > { %v1453_v51 = vpop.eup %1452  ;;  %v722_v45 = vmul.f32 %v1451_v37, %v1793_v22 }
 0x13f   : > { %v1455_v38 = vpop.eup %1454 }
 0x140   : > { %v1457_v40 = vpop.eup %1456  ;;  %v725_v34 = vmul.f32 %v1455_v38, %v1801_v20  ;;  %v738_v20 = vmul.f32 %v1453_v51, %v1797_v30 }
 0x141   : > { %v1459_v59 = vpop.eup %1458  ;;  %v741_v60 = vmul.f32 %v1457_v40, %v1805_v43 }
 0x142   : > { %v1461_v39 = vpop.eup %1460  ;;  %v1160_v46 = vpack.c.bf16 %v725_v34, %v724_v54  ;;  %v723_v25 = vmul.f32 %v1459_v59, %v1809_v36 }
 0x143   : > { %v1200_v55 = vpack.c.bf16 %v741_v60, %v740_v28  ;;  %v739_v18 = vmul.f32 %v1461_v39, %v1815_v24 }
 0x144   : > { %1208 = vst [vmem:[%s1775_s10 + $0x38] sm:$0xff] %v1160_v46   ;;  %v1155_v31 = vpack.c.bf16 %v723_v25, %v722_v45 }
 0x145   : > { %1216 = vst [vmem:[%s1775_s10 + $0x78] sm:$0xff] %v1200_v55   ;;  %v1195_v22 = vpack.c.bf16 %v739_v18, %v738_v20 }
 0x146   : > { %1207 = vst [vmem:[%s1775_s10 + $0x30] sm:$0xff] %v1155_v31  }
 0x147   : > { %1215 = vst [vmem:[%s1775_s10 + $0x70] sm:$0xff] %v1195_v22  }
 0x148   : > { %1475 = shalt.err (!%p1472_p3)
}
 0x149   : > { %s1476_s29 = scalar_lea.hbm %s1859_s16, 2048  ;;  %s1480_s5 = scalar_lea.hbm %s1912_s3, 16384 }
 0x14a   : > { %p1477_p4 = scmp.ne.s32.totalorder %s1859_s16, %s1476_s29  ;;  %p1481_p9 = scmp.lt.u32.totalorder %s1859_s16, %s1912_s3 }
 0x14b   : > { %p1482_p10 = scmp.lt.u32.totalorder %s1480_s5, %s1476_s29  ;;  %p1484_p12 = scmp.lt.u32.totalorder %s1476_s29, %s1859_s16 }
 0x14c   : > { %p1478_p7 = pnand %p1477_p4, %p1587_p5 }
 0x14d   : > { %p1483_p11 = por %p1482_p10, %p1481_p9 }
 0x14e   : > { %p1479_p8 = pneg %p1478_p7 }
 0x14f   : > { %p1485_p13 = por %p1484_p12, %p1483_p11 }
 0x151   : > { %p1486_p0 = pnand %p1485_p13, %p1479_p8 }
 0x153   : > { %1489 = shalt.err (!%p1486_p0)
}
 0x154   : > { %s1527_s8 = smov 64   ;;  %s1528_s9 = smov 4  }
 0x155   : > { %1275 = dma.vmem_to_hbm [thread:$0]  (%p1587_p5), %s1861_s17, 2048, %s1859_s16, %s1868_s24, %s1527_s8, %s1527_s8, %s1528_s9  }
 0x156 PF: > { %p1281_p1 = scmp.ge.s32.totalorder %s1524_s15, 2  ;;  %s931_s10 = sand.u32 1, %s1512_s12  }
 0x157   : > { %s932_s11 = scalar_lea.sflag [#allocation3], %s931_s10 }
 0x158   : > { %p1278_p2 = pnand %p1281_p1, %p1591_p6 }
 0x15a   : > { %1507 = dma.done.wait (!%p1278_p2), %s932_s11, 2048  }
 0x15b   : > { %1509 = vsyncadd (!%p1278_p2), %s932_s11, 4294965248  ;;  %p13_p3 = scmp.ge.s32.totalorder %s1574_s18, 10   ;;  %s1915_s12 = smov %s1516_s13 }
 0x15c   : > { %s1916_s13 = smov %s1520_s14  ;;  %s1917_s14 = smov %s1585_s21 }
 0x15d   : > { %s1918_s15 = smov %s1574_s18  ;;  %15 = sbr.rel (!%p13_p3) target bundleno = 3 (0x3), region = 67 }
 0x164   :  { %937 = vsyncpa [#allocation3], 1 }
 0x165   :  { %939 = vsyncpa [#allocation3 + $0x1], 1 }

</bundles_post_ra>
